<compile_context>
chip_gen: v7x
topology: tpu7x:2x2x1
jax: 0.10.0
libtpu: 0.0.40
codegen_flags: <defaults>
</compile_context>

<pallas_src>
import functools

import jax
import jax.numpy as jnp
import numpy as np
from jax.experimental import pallas as pl
from jax.experimental.pallas import tpu as pltpu

LANE = 128        # TPU lane width; hidden/output feature dims zero-padded to this.
SUBLANE_PACK = 16 # bf16 sublane packing; input feature dim padded to this.


def _round_up(x, m):
    return ((x + m - 1) // m) * m


def fc_kernel(x_ref, w_ref, b_ref, o_ref):
    """One batch tile of the 3-layer MLP.

    x_ref: (B_T, d_in_pad)  bf16/f32  flattened, narrow (not 128-padded) input tile
    w_ref: (3, 128, 128)    bf16/f32  [W1.T | W2.T | W3.T], zero-padded, VMEM-resident
    b_ref: (3, 128)         f32       [b1 | b2 | b3], zero-padded, VMEM-resident
    o_ref: (B_T, 128)       bf16/f32  layer-3 output (padded cols are b3 pad = 0)
    """
    w_dtype = w_ref.dtype
    d_in_pad = x_ref.shape[-1]          # static
    x = x_ref[...]

    # layer 1: Linear + ReLU.  K = d_in_pad (<=128); static sublane slice of W1.T
    # is tile-aligned (d_in_pad is a multiple of 16).
    h = jnp.dot(x, w_ref[0, :d_in_pad, :], preferred_element_type=jnp.float32)
    h = jnp.maximum(h + b_ref[0:1, :], 0.0)

    # layer 2: Linear + ReLU
    h = jnp.dot(h.astype(w_dtype), w_ref[1], preferred_element_type=jnp.float32)
    h = jnp.maximum(h + b_ref[1:2, :], 0.0)

    # layer 3: Linear (no activation); bias add in f32, final cast to out dtype.
    h = jnp.dot(h.astype(w_dtype), w_ref[2], preferred_element_type=jnp.float32)
    o_ref[...] = (h + b_ref[2:3, :]).astype(o_ref.dtype)


def pack_params(params, *, param_dtype=jnp.bfloat16):
    """Pack torch-style (W: (out,in), b: (out,)) params ONCE into MXU-ready slabs.

    Returns (w_slab (3,128,128) param_dtype, b_slab (3,128) f32, dims dict).
    Zero padding is numerically exact through Linear+ReLU.
    """
    w1, b1 = params["w1"], params["b1"]
    w2, b2 = params["w2"], params["b2"]
    w3, b3 = params["w3"], params["b3"]
    d_in = w1.shape[1]
    hidden = w1.shape[0]
    num_actions = w3.shape[0]
    if max(d_in, hidden, num_actions) > LANE:
        raise NotImplementedError("small-net path assumes every feature dim <= 128")
    d_in_pad = _round_up(max(d_in, SUBLANE_PACK), SUBLANE_PACK)

    w_slab = jnp.zeros((3, LANE, LANE), jnp.float32)
    w_slab = w_slab.at[0, :d_in, :hidden].set(w1.T.astype(jnp.float32))
    w_slab = w_slab.at[1, :hidden, :hidden].set(w2.T.astype(jnp.float32))
    w_slab = w_slab.at[2, :hidden, :num_actions].set(w3.T.astype(jnp.float32))
    w_slab = w_slab.astype(param_dtype)

    b_slab = jnp.zeros((3, LANE), jnp.float32)
    b_slab = b_slab.at[0, :hidden].set(b1.astype(jnp.float32))
    b_slab = b_slab.at[1, :hidden].set(b2.astype(jnp.float32))
    b_slab = b_slab.at[2, :num_actions].set(b3.astype(jnp.float32))

    dims = dict(d_in=d_in, d_in_pad=d_in_pad, hidden=hidden,
                num_actions=num_actions)
    return w_slab, b_slab, dims


def fc_network_forward(x, w_slab, b_slab, *, d_in_pad, num_actions,
                       block_b=4096, min_grid_steps=2,
                       out_dtype=jnp.bfloat16):
    """x: (B, nc, *input_shape).  w_slab/b_slab: pre-packed via pack_params()."""
    B = x.shape[0]
    x_flat = x.reshape(B, -1)            # == x.view(x.size(0), -1)
    d_in = x_flat.shape[1]
    param_dtype = w_slab.dtype

    # ---- batch tiling: large tiles to amortize per-step overhead, but keep ----
    # ---- >= min_grid_steps tiles when B is big enough (v7x megacore).       ----
    if B <= 8:
        b_t = 8
    else:
        b_t = min(block_b, _round_up(-(-B // min_grid_steps), 8))
    b_pad = _round_up(B, b_t)
    grid = (b_pad // b_t,)

    # ---- narrow input, built directly in the MXU operand dtype ----
    x_p = jnp.zeros((b_pad, d_in_pad), param_dtype)
    x_p = x_p.at[:B, :d_in].set(x_flat.astype(param_dtype))

    out = pl.pallas_call(
        fc_kernel,
        out_shape=jax.ShapeDtypeStruct((b_pad, LANE), out_dtype),
        grid=grid,
        in_specs=[
            # activations: tiled over the batch grid axis; last dim = full array
            # dim (legal even though < 128)
            pl.BlockSpec((b_t, d_in_pad), lambda i: (i, 0)),
            # weights: constant index_map -> single DMA, resident across steps
            pl.BlockSpec((3, LANE, LANE), lambda i: (0, 0, 0)),
            # biases: constant index_map -> single DMA, resident across steps
            pl.BlockSpec((3, LANE), lambda i: (0, 0)),
        ],
        # lane-dense 128-wide output block (avoid masked partial stores)
        out_specs=pl.BlockSpec((b_t, LANE), lambda i: (i, 0)),
        compiler_params=pltpu.CompilerParams(
            dimension_semantics=("parallel",),
            vmem_limit_bytes=32 * 1024 * 1024,
        ),
    )(x_p, w_slab, b_slab)

    return out[:B, :num_actions]


def init_params(key, in_features, hidden, num_actions):
    """Deterministic PyTorch-Linear-style init (uniform(-1/sqrt(fan_in), +))."""
    dims = [(hidden, in_features), (hidden, hidden), (num_actions, hidden)]
    params = {}
    for i, (out_f, in_f) in enumerate(dims, start=1):
        key, kw, kb = jax.random.split(key, 3)
        bound = 1.0 / np.sqrt(in_f)
        params[f"w{i}"] = jax.random.uniform(
            kw, (out_f, in_f), jnp.float32, minval=-bound, maxval=bound)
        params[f"b{i}"] = jax.random.uniform(
            kb, (out_f,), jnp.float32, minval=-bound, maxval=bound)
    return params


def reference_forward_f32(x, params):
    """Plain-JAX f32 reference replicating the PyTorch module exactly."""
    h = x.reshape(x.shape[0], -1)
    h = jnp.maximum(h @ params["w1"].T + params["b1"], 0.0)
    h = jnp.maximum(h @ params["w2"].T + params["b2"], 0.0)
    return h @ params["w3"].T + params["b3"]


def reference_forward_emulated(x, params, param_dtype=jnp.bfloat16):
    """Same math with the kernel's operand quantization (bf16 dot operands,
    f32 accumulation / bias / ReLU) — for a tight numerical check."""
    def q(a):
        return a.astype(param_dtype).astype(jnp.float32)
    h = q(x.reshape(x.shape[0], -1))
    h = jnp.maximum(jnp.dot(h, q(params["w1"].T)) + params["b1"], 0.0)
    h = jnp.maximum(jnp.dot(q(h), q(params["w2"].T)) + params["b2"], 0.0)
    return jnp.dot(q(h), q(params["w3"].T)) + params["b3"]


if __name__ == "__main__":
    # FCNetwork(input_shape=(4,), nc=4, num_actions=18)  ->  in_features = 4*4 = 16
    batch = 2
    nc = 4
    obs_dim = 4
    hidden = 24
    num_actions = 18
    in_features = nc * obs_dim

    key = jax.random.PRNGKey(0)
    key, kx, kx2 = jax.random.split(key, 3)
    x = jax.random.normal(kx, (batch, nc, obs_dim), dtype=jnp.float32)
    params = init_params(key, in_features, hidden, num_actions)

    # Pack parameters ONCE (hoisted out of the per-call forward path).
    w_slab, b_slab, dims = pack_params(params, param_dtype=jnp.bfloat16)

    fwd_bf16 = jax.jit(functools.partial(
        fc_network_forward,
        d_in_pad=dims["d_in_pad"], num_actions=dims["num_actions"]))
    fwd_f32 = jax.jit(functools.partial(
        fc_network_forward,
        d_in_pad=dims["d_in_pad"], num_actions=dims["num_actions"],
        out_dtype=jnp.float32))

    # --- primary run: default bf16 output stream ---
    out = jax.block_until_ready(fwd_bf16(x, w_slab, b_slab))
    assert out.shape == (batch, num_actions)

    ref_q = reference_forward_emulated(x, params)
    np.testing.assert_allclose(np.asarray(out, dtype=np.float32),
                               np.asarray(ref_q),
                               rtol=1e-2, atol=1e-2)

    # --- tight check: f32 output path vs emulated reference ---
    out_f32 = jax.block_until_ready(fwd_f32(x, w_slab, b_slab))
    np.testing.assert_allclose(np.asarray(out_f32), np.asarray(ref_q),
                               rtol=1e-4, atol=1e-4)

    # --- loose check vs the exact f32 PyTorch-equivalent forward ---
    ref = reference_forward_f32(x, params)
    np.testing.assert_allclose(np.asarray(out_f32), np.asarray(ref),
                               rtol=5e-2, atol=3e-2)

    # --- multi-tile grid path (exercises batch tiling / row padding) ---
    big_b = 1024
    x_big = jax.random.normal(kx2, (big_b, nc, obs_dim), dtype=jnp.float32)
    out_big = jax.block_until_ready(fwd_bf16(x_big, w_slab, b_slab))
    assert out_big.shape == (big_b, num_actions)
    ref_big = reference_forward_emulated(x_big, params)
    np.testing.assert_allclose(np.asarray(out_big, dtype=np.float32),
                               np.asarray(ref_big),
                               rtol=1e-2, atol=1e-2)

    print("KERNEL_OK")
</pallas_src>

<mosaic_0001>
module attributes {stable_mosaic.version = 11 : i64} {
  func.func @fc_kernel(%arg0: i32, %arg1: memref<8x16xbf16, #tpu.memory_space<vmem>>, %arg2: memref<3x128x128xbf16, #tpu.memory_space<vmem>>, %arg3: memref<3x128xf32, #tpu.memory_space<vmem>>, %arg4: memref<8x128xbf16, #tpu.memory_space<vmem>>) attributes {dimension_semantics = [#tpu.dimension_semantics<parallel>], iteration_bounds = array<i64: 1>, scalar_prefetch = 0 : i64, scratch_operands = 0 : i64, tpu.core_type = #tpu.core_type<tc>, window_params = [{transform_indices = @transform_0, window_bounds = array<i64: 8, 16>}, {pipeline_mode = #tpu.pipeline_mode<synchronous>, transform_indices = @transform_1, window_bounds = array<i64: 3, 128, 128>}, {pipeline_mode = #tpu.pipeline_mode<synchronous>, transform_indices = @transform_2, window_bounds = array<i64: 3, 128>}, {transform_indices = @transform_3, window_bounds = array<i64: 8, 128>}]} {
    %c0 = arith.constant 0 : index
    %c0_0 = arith.constant 0 : index
    %0 = vector.load %arg1[%c0, %c0_0] : memref<8x16xbf16, #tpu.memory_space<vmem>>, vector<8x16xbf16>
    %c0_1 = arith.constant 0 : index
    %c0_2 = arith.constant 0 : index
    %c0_3 = arith.constant 0 : index
    %1 = vector.load %arg2[%c0_1, %c0_2, %c0_3] : memref<3x128x128xbf16, #tpu.memory_space<vmem>>, vector<1x16x128xbf16>
    %2 = vector.shape_cast %1 : vector<1x16x128xbf16> to vector<16x128xbf16>
    %cst = arith.constant dense<0.000000e+00> : vector<8x128xf32>
    %3 = tpu.matmul %0, %2, %cst {dimension_numbers = #tpu.dot_dimension_numbers<[1], [0], [0], [1], [0, 0, 1, 1], [], []>} : vector<8x16xbf16>, vector<16x128xbf16>, vector<8x128xf32> -> vector<8x128xf32>
    %c0_4 = arith.constant 0 : index
    %c0_5 = arith.constant 0 : index
    %4 = vector.load %arg3[%c0_4, %c0_5] : memref<3x128xf32, #tpu.memory_space<vmem>>, vector<1x128xf32>
    %5 = vector.broadcast %4 : vector<1x128xf32> to vector<8x128xf32>
    %6 = arith.addf %3, %5 : vector<8x128xf32>
    %cst_6 = arith.constant 0.000000e+00 : f32
    %7 = vector.broadcast %cst_6 : f32 to vector<8x128xf32>
    %8 = arith.maximumf %6, %7 : vector<8x128xf32>
    %9 = arith.truncf %8 : vector<8x128xf32> to vector<8x128xbf16>
    %c1 = arith.constant 1 : index
    %c0_7 = arith.constant 0 : index
    %c0_8 = arith.constant 0 : index
    %10 = vector.load %arg2[%c1, %c0_7, %c0_8] : memref<3x128x128xbf16, #tpu.memory_space<vmem>>, vector<1x128x128xbf16>
    %11 = vector.shape_cast %10 : vector<1x128x128xbf16> to vector<128x128xbf16>
    %cst_9 = arith.constant dense<0.000000e+00> : vector<8x128xf32>
    %12 = tpu.matmul %9, %11, %cst_9 {dimension_numbers = #tpu.dot_dimension_numbers<[1], [0], [0], [1], [0, 0, 1, 1], [], []>} : vector<8x128xbf16>, vector<128x128xbf16>, vector<8x128xf32> -> vector<8x128xf32>
    %c1_10 = arith.constant 1 : index
    %c0_11 = arith.constant 0 : index
    %13 = vector.load %arg3[%c1_10, %c0_11] : memref<3x128xf32, #tpu.memory_space<vmem>>, vector<1x128xf32>
    %14 = vector.broadcast %13 : vector<1x128xf32> to vector<8x128xf32>
    %15 = arith.addf %12, %14 : vector<8x128xf32>
    %cst_12 = arith.constant 0.000000e+00 : f32
    %16 = vector.broadcast %cst_12 : f32 to vector<8x128xf32>
    %17 = arith.maximumf %15, %16 : vector<8x128xf32>
    %18 = arith.truncf %17 : vector<8x128xf32> to vector<8x128xbf16>
    %c2 = arith.constant 2 : index
    %c0_13 = arith.constant 0 : index
    %c0_14 = arith.constant 0 : index
    %19 = vector.load %arg2[%c2, %c0_13, %c0_14] : memref<3x128x128xbf16, #tpu.memory_space<vmem>>, vector<1x128x128xbf16>
    %20 = vector.shape_cast %19 : vector<1x128x128xbf16> to vector<128x128xbf16>
    %cst_15 = arith.constant dense<0.000000e+00> : vector<8x128xf32>
    %21 = tpu.matmul %18, %20, %cst_15 {dimension_numbers = #tpu.dot_dimension_numbers<[1], [0], [0], [1], [0, 0, 1, 1], [], []>} : vector<8x128xbf16>, vector<128x128xbf16>, vector<8x128xf32> -> vector<8x128xf32>
    %c2_16 = arith.constant 2 : index
    %c0_17 = arith.constant 0 : index
    %22 = vector.load %arg3[%c2_16, %c0_17] : memref<3x128xf32, #tpu.memory_space<vmem>>, vector<1x128xf32>
    %23 = vector.broadcast %22 : vector<1x128xf32> to vector<8x128xf32>
    %24 = arith.addf %21, %23 : vector<8x128xf32>
    %25 = arith.truncf %24 : vector<8x128xf32> to vector<8x128xbf16>
    %c0_18 = arith.constant 0 : index
    %c0_19 = arith.constant 0 : index
    %26 = vector.load %arg4[%c0_18, %c0_19] : memref<8x128xbf16, #tpu.memory_space<vmem>>, vector<8x128xbf16>
    tpu.vector_store %arg4[%c0_18, %c0_19], %25 {strides = array<i32>} : memref<8x128xbf16, #tpu.memory_space<vmem>>, vector<8x128xbf16>,
    return
  }
  func.func @transform_0(%arg0: i32) -> (i32, i32) {
    %c0_i32 = arith.constant 0 : i32
    %c0_i32_0 = arith.constant 0 : i32
    return %arg0, %c0_i32 : i32, i32
  }
  func.func @transform_1(%arg0: i32) -> (i32, i32, i32) {
    %c0_i32 = arith.constant 0 : i32
    %c0_i32_0 = arith.constant 0 : i32
    %c0_i32_1 = arith.constant 0 : i32
    %c0_i32_2 = arith.constant 0 : i32
    return %c0_i32, %c0_i32_0, %c0_i32_1 : i32, i32, i32
  }
  func.func @transform_2(%arg0: i32) -> (i32, i32) {
    %c0_i32 = arith.constant 0 : i32
    %c0_i32_0 = arith.constant 0 : i32
    %c0_i32_1 = arith.constant 0 : i32
    return %c0_i32, %c0_i32_0 : i32, i32
  }
  func.func @transform_3(%arg0: i32) -> (i32, i32) {
    %c0_i32 = arith.constant 0 : i32
    %c0_i32_0 = arith.constant 0 : i32
    return %arg0, %c0_i32 : i32, i32
  }
}

</mosaic_0001>

<bundles_post_ra>
// kernel: fc_network_forward.1
= control target key start
LH: loop header
LB: loop body
LE: loop exit
PB: predicated region body
PF: predicated region fallthrough
CT: control target
= control target key end

     0   :  { %8 = vsyncpa [#allocation3], 0  ;;  %s451_s12 = smov [#allocation2]   ;;  %s523_s0 = inlined_call_operand.vmem [shape: bf16[8,16], index: 0, kind: input, shape index: {}]   ;;  %s524_s1 = inlined_call_operand.hbm [shape: bf16[3,128,128], index: 1, kind: input, shape index: {}]   ;;  %s525_s2 = inlined_call_operand.vmem [shape: f32[3,128], index: 2, kind: input, shape index: {}]   ;;  %s526_s3 = inlined_call_operand.vmem [shape: bf16[8,128], index: 3, kind: output, shape index: {}]  }
   0x1   :  { %s16_s13 = sshll.u32 %s451_s12, 4  ;;  %s427_s16 = scalar_lea.hbm %s524_s1, 3072  ;;  %s17_s13 = int_to_ptr.vmem [resolvable:$true] %s16_s13 }
   0x2   :  { %p428_p0 = scmp.ne.s32.totalorder %s524_s1, %s427_s16  ;;  %p431_p1 = scmp.lt.u32.totalorder %s427_s16, %s524_s1 }
   0x4   :  { %p433_p2 = pnand %p431_p1, %p428_p0 }
   0x6   :  { %436 = shalt.err (!%p433_p2)
}
   0x7   :  { %s437_s21 = scalar_lea.vmem %s17_s13, 3072  ;;  %p442_p4 = scmp.lt.s32.totalorder %s17_s13, %s17_s13 }
   0x8   :  { %p438_p3 = scmp.ne.s32.totalorder %s17_s13, %s437_s21  ;;  %p443_p5 = scmp.lt.s32.totalorder %s437_s21, %s437_s21 }
   0xa   :  { %p444_p6 = por %p443_p5, %p442_p4 }
   0xc   :  { %p445_p7 = pnand %p444_p6, %p438_p3 }
   0xe   :  { %448 = shalt.err (!%p445_p7)
}
   0xf   :  { %s452_s22 = smov 64   ;;  %s453_s23 = smov 4  }
  0x10   :  { %22 = dma.hbm_to_vmem [thread:$0]  %s524_s1, 3072, %s17_s13, [#allocation3], %s452_s22, %s452_s22, %s453_s23  }
  0x11   :  { %449 = dma.done.wait [#allocation3], 3072  }
  0x12   :  { %450 = vsyncadd [#allocation3], 4294964224  ;;  %v454_v0 = vmov 0.0   ;;  %vm455_vm0 = vmmov 0   ;;  %v410_v1 = vld [vmem:[#allocation2] sm:$0xff]   ;;  %vm43_vm1 = vcmask 130048  }
  0x13   :  { %359 = vmatprep.subr.bf16.mxu0 %v454_v0  ;;  %361 = vmatprep.mubr.msk.bf16.mxu0 %vm455_vm0, %v454_v0  ;;  %v29_v2 = vld [vmem:[%s523_s0] sm:$0xf]  ;;  %v412_v4 = vld [vmem:[#allocation2 + $0x48] sm:$0xff]   ;;  %v413_v5 = vld [vmem:[#allocation2 + $0x50] sm:$0xff]  }
  0x14   :  { %365 = vmatprep.subr.bf16.mxu1 %v454_v0  ;;  %381 = vmatprep.mubr.msk.bf16.mxu1 %vm455_vm0, %v454_v0  ;;  %v411_v3 = vld [vmem:[#allocation2 + $0x40] sm:$0xff]   ;;  %v414_v6 = vld [vmem:[#allocation2 + $0x58] sm:$0xff]   ;;  %v416_v8 = vld [vmem:[#allocation2 + $0x68] sm:$0xff]  }
  0x15   :  { %360 = vmatpush3.bf16.msra.mxu0 %v410_v1  ;;  %366 = vmatpush3.bf16.msra.mxu1 %v411_v3  ;;  %v415_v7 = vld [vmem:[#allocation2 + $0x60] sm:$0xff]   ;;  %v417_v9 = vld [vmem:[#allocation2 + $0x70] sm:$0xff]   ;;  %v418_v10 = vld [vmem:[#allocation2 + $0x78] sm:$0xff]  }
  0x16   :  { %385 = vmatprep.subr.bf16.mxu0 %v454_v0  ;;  %367 = vmatprep.subr.bf16.mxu1 %v454_v0  ;;  %v419_v11 = vld [vmem:[#allocation2 + $0x80] sm:$0xff]   ;;  %v420_v12 = vld [vmem:[#allocation2 + $0x88] sm:$0xff]   ;;  %v421_v13 = vld [vmem:[#allocation2 + $0x90] sm:$0xff]  }
  0x17   :  { %v422_v14 = vld [vmem:[#allocation2 + $0x98] sm:$0xff]   ;;  %v423_v15 = vld [vmem:[#allocation2 + $0xa0] sm:$0xff]   ;;  %v424_v16 = vld [vmem:[#allocation2 + $0xa8] sm:$0xff]  }
  0x18   :  { %362 = vmatmul.mubr.msk.bf16.vlgmr.msra.gmra.mrb[0].mxu0 %vm43_vm1, %v29_v2  ;;  %v318_v17 = vld [vmem:[%s525_s2] ss:$0 sm:$0xff]  ;;  %v425_v25 = vld [vmem:[#allocation2 + $0xb0] sm:$0xff]   ;;  %v426_v26 = vld [vmem:[#allocation2 + $0xb8] sm:$0xff]  }
  0x19   :  { %401 = vmatprep.mubr.msk.bf16.mxu0 %vm455_vm0, %v454_v0  ;;  %368 = vmatpush3.bf16.msra.mxu1 %v412_v4  ;;  %v321_v27 = vld [vmem:[%s525_s2 + $0x1] ss:$0 sm:$0xff]  ;;  %v330_v35 = vld [vmem:[%s525_s2 + $0x2] ss:$0 sm:$0xff] }
  0x1a   :  { %369 = vmatprep.subr.bf16.mxu1 %v454_v0  ;;  %386 = vmatpush3.bf16.msra.mxu0 %v419_v11 }
  0x1b   :  { %387 = vmatprep.subr.bf16.mxu0 %v454_v0 }
  0x1d   :  { %370 = vmatpush3.bf16.msra.mxu1 %v413_v5 }
  0x1e   :  { %371 = vmatprep.subr.bf16.mxu1 %v454_v0  ;;  %388 = vmatpush3.bf16.msra.mxu0 %v420_v12 }
  0x1f   :  { %389 = vmatprep.subr.bf16.mxu0 %v454_v0 }
  0x21   :  { %372 = vmatpush3.bf16.msra.mxu1 %v414_v6 }
  0x22   :  { %373 = vmatprep.subr.bf16.mxu1 %v454_v0  ;;  %390 = vmatpush3.bf16.msra.mxu0 %v421_v13 }
  0x23   :  { %391 = vmatprep.subr.bf16.mxu0 %v454_v0 }
  0x25   :  { %374 = vmatpush3.bf16.msra.mxu1 %v415_v7 }
  0x26   :  { %375 = vmatprep.subr.bf16.mxu1 %v454_v0  ;;  %392 = vmatpush3.bf16.msra.mxu0 %v422_v14 }
  0x27   :  { %393 = vmatprep.subr.bf16.mxu0 %v454_v0 }
  0x29   :  { %376 = vmatpush3.bf16.msra.mxu1 %v416_v8 }
  0x2a   :  { %377 = vmatprep.subr.bf16.mxu1 %v454_v0  ;;  %394 = vmatpush3.bf16.msra.mxu0 %v423_v15 }
  0x2b   :  { %395 = vmatprep.subr.bf16.mxu0 %v454_v0 }
  0x2d   :  { %378 = vmatpush3.bf16.msra.mxu1 %v417_v9 }
  0x2e   :  { %379 = vmatprep.subr.bf16.mxu1 %v454_v0  ;;  %396 = vmatpush3.bf16.msra.mxu0 %v424_v16 }
  0x2f   :  { %397 = vmatprep.subr.bf16.mxu0 %v454_v0 }
  0x31   :  { %380 = vmatpush3.bf16.msra.mxu1 %v418_v10 }
  0x32   :  { %398 = vmatpush3.bf16.msra.mxu0 %v425_v25 }
  0x33   :  { %399 = vmatprep.subr.bf16.mxu0 %v454_v0 }
  0x36   :  { %400 = vmatpush3.bf16.msra.mxu0 %v426_v26 }
  0xeb   :  { %v81_v18 = vpop.f32.mrb[0].mxu0 }
  0xec   :  { %v82_v19 = vadd.f32 %v318_v17, %v81_v18  ;;  %v363_v20 = vpop.f32.mrb[1].mxu0 }
  0xed   :  { %v84_v21 = vpop.f32.mrb[2].mxu0 }
  0xee   :  { %v87_v22 = vmax.f32 %v82_v19, 0.0  ;;  %v364_v23 = vpop.f32.mrb[3].mxu0 }
  0xf0   :  { %v88_v24 = vpack.c.bf16 %v87_v22, %v87_v22 }
  0xf2   :  { %382 = vmatmul.mubr.bf16.vlgmr.msra.gmra.mrb[0].mxu1 %v88_v24 }
 0x1c5   :  { %v193_v28 = vpop.f32.mrb[0].mxu1 }
 0x1c6   :  { %v194_v29 = vadd.f32 %v321_v27, %v193_v28  ;;  %v383_v30 = vpop.f32.mrb[1].mxu1 }
 0x1c7   :  { %v196_v31 = vpop.f32.mrb[2].mxu1 }
 0x1c8   :  { %v199_v32 = vmax.f32 %v194_v29, 0.0  ;;  %v384_v33 = vpop.f32.mrb[3].mxu1 }
 0x1ca   :  { %v200_v34 = vpack.c.bf16 %v199_v32, %v199_v32 }
 0x1cc   :  { %402 = vmatmul.mubr.bf16.vlgmr.msra.gmra.mrb[4].mxu0 %v200_v34 }
 0x29f   :  { %v305_v36 = vpop.f32.mrb[4].mxu0 }
 0x2a0   :  { %v306_v37 = vadd.f32 %v330_v35, %v305_v36  ;;  %v403_v38 = vpop.f32.mrb[5].mxu0 }
 0x2a1   :  { %v308_v39 = vpop.f32.mrb[6].mxu0 }
 0x2a2   :  { %v311_v40 = vpack.c.bf16 %v306_v37, %v306_v37  ;;  %v404_v41 = vpop.f32.mrb[7].mxu0 }
 0x2a4   :  { %312 = vst [vmem:[%s526_s3] sm:$0xf] %v311_v40 }
 0x2a5   :  { %317 = vsyncpa [#allocation3], 1 }

</bundles_post_ra>
